<compile_context>
chip_gen: v5e
topology: v5e:2x2
jax: 0.10.0
libtpu: 0.0.40
codegen_flags: <defaults>
</compile_context>

<pallas_src>
import math
import functools

import numpy as np
import jax
import jax.numpy as jnp
from jax.experimental import pallas as pl
from jax.experimental.pallas import tpu as pltpu


# ----------------------------------------------------------------------------
# VMEM budget: ~3/4 of physical VMEM, capped at 100 MiB (safe on v5e/v6e/v7x).
# ----------------------------------------------------------------------------

@functools.lru_cache(maxsize=None)
def _vmem_limit_bytes():
    try:
        cap = pltpu.get_tpu_info().vmem_capacity_bytes
        return int(min(100 * 2**20, (cap * 3) // 4))
    except Exception:
        return 64 * 2**20


# ----------------------------------------------------------------------------
# Tiled linear kernel:  y = x @ w.T + b   (PyTorch nn.Linear semantics)
# ----------------------------------------------------------------------------

def _linear_kernel(x_ref, w_ref, b_ref, o_ref):
    # x: [tm, Hin] bf16, w: [Hin, tn] bf16, b: [1, tn] f32 -> o: [tm, tn]
    acc = jnp.dot(x_ref[...], w_ref[...], preferred_element_type=jnp.float32)
    o_ref[...] = (acc + b_ref[...]).astype(o_ref.dtype)


def linear(x, w, b, out_dtype=jnp.bfloat16):
    """y = x @ w.T + b.  x: [M, Hin], w: [Hout, Hin], b: [Hout]."""
    M, Hin = x.shape
    Hout = w.shape[0]
    if M < 8:
        # Not worth a kernel launch for a handful of rows.
        y = x.astype(jnp.float32) @ w.T.astype(jnp.float32) + b.astype(jnp.float32)
        return y.astype(out_dtype)

    tm = 512 if M >= 512 else max(8, (M // 8) * 8)
    tn = Hout if Hout <= 2048 else 1024
    grid = (pl.cdiv(M, tm), pl.cdiv(Hout, tn))

    xb = x.astype(jnp.bfloat16)
    wb = jnp.transpose(w).astype(jnp.bfloat16)        # [Hin, Hout]
    b2 = b.reshape(1, Hout).astype(jnp.float32)

    return pl.pallas_call(
        _linear_kernel,
        out_shape=jax.ShapeDtypeStruct((M, Hout), out_dtype),
        grid=grid,
        in_specs=[
            pl.BlockSpec((tm, Hin), lambda i, j: (i, 0)),
            pl.BlockSpec((Hin, tn), lambda i, j: (0, j)),
            pl.BlockSpec((1, tn), lambda i, j: (0, j)),
        ],
        out_specs=pl.BlockSpec((tm, tn), lambda i, j: (i, j)),
        compiler_params=pltpu.CompilerParams(
            dimension_semantics=("parallel", "parallel"),
            vmem_limit_bytes=_vmem_limit_bytes()),
    )(xb, wb, b2)


# ----------------------------------------------------------------------------
# Fused attention kernel: head-major, (batch, head) parallel grid
# ----------------------------------------------------------------------------

def _attention_kernel(q_ref, k_ref, v_ref, bias_ref, o_ref):
    # q: [1, 1, Q, d] bf16 (1/sqrt(d) already folded into the query weights)
    # k, v: [1, 1, K, d] bf16
    # bias: [1, 1, Q, K] bf16  (relative c2p + p2c bias, scale already folded)
    # o: [1, 1, Q, d] bf16
    q = q_ref[0, 0]                                                  # [Q, d]
    k = k_ref[0, 0]                                                  # [K, d]
    v = v_ref[0, 0]                                                  # [K, d]

    # content-content scores on the MXU (bf16 in, f32 accumulate)
    s = jax.lax.dot_general(q, k, (((1,), (1,)), ((), ())),
                            preferred_element_type=jnp.float32)      # [Q, K]
    s = s + bias_ref[0, 0].astype(jnp.float32)                       # add in f32

    # softmax over keys (exact reciprocal; approx=True -> EUP if tolerable)
    m = jnp.max(s, axis=-1, keepdims=True)
    e = jnp.exp(s - m)
    l = jnp.sum(e, axis=-1, keepdims=True)
    p = e * pl.reciprocal(l, approx=False)

    o = jnp.dot(p.astype(v.dtype), v,
                preferred_element_type=jnp.float32)                  # [Q, d]
    o_ref[0, 0] = o.astype(o_ref.dtype)


def attention(q, k, v, bias, num_heads):
    """q/k/v: [B, S, H] bf16, bias: [B, h, Q, K] bf16 -> [B, Q, H] bf16."""
    B, Q, H = q.shape
    K = k.shape[1]
    d = H // num_heads

    # Head-major layout for the kernel (XLA transposes; free reshapes elsewhere).
    qh = q.reshape(B, Q, num_heads, d).transpose(0, 2, 1, 3)         # [B,h,Q,d]
    kh = k.reshape(B, K, num_heads, d).transpose(0, 2, 1, 3)
    vh = v.reshape(B, K, num_heads, d).transpose(0, 2, 1, 3)

    out = pl.pallas_call(
        _attention_kernel,
        out_shape=jax.ShapeDtypeStruct((B, num_heads, Q, d), jnp.bfloat16),
        grid=(B, num_heads),
        in_specs=[
            pl.BlockSpec((1, 1, Q, d), lambda b, h: (b, h, 0, 0)),
            pl.BlockSpec((1, 1, K, d), lambda b, h: (b, h, 0, 0)),
            pl.BlockSpec((1, 1, K, d), lambda b, h: (b, h, 0, 0)),
            pl.BlockSpec((1, 1, Q, K), lambda b, h: (b, h, 0, 0)),
        ],
        out_specs=pl.BlockSpec((1, 1, Q, d), lambda b, h: (b, h, 0, 0)),
        compiler_params=pltpu.CompilerParams(
            dimension_semantics=("parallel", "parallel"),
            vmem_limit_bytes=_vmem_limit_bytes()),
    )(qh, kh, vh, bias)

    return out.transpose(0, 2, 1, 3).reshape(B, Q, H)                # [B,Q,H]


# ----------------------------------------------------------------------------
# Log-bucket relative position indices (matches make_log_bucket_position)
# ----------------------------------------------------------------------------

def build_position_indices(qlen, klen, bucket_size, max_position):
    rel = (np.arange(qlen, dtype=np.int64)[:, None]
           - np.arange(klen, dtype=np.int64)[None, :])
    sign = np.sign(rel)
    mid = bucket_size // 2
    abs_pos = np.where((rel < mid) & (rel > -mid),
                       mid - 1,
                       np.minimum(np.abs(rel), max_position - 1))
    log_pos = np.ceil(np.log(abs_pos / mid)
                      / math.log((max_position - 1) / mid)
                      * (mid - 1)).astype(np.int64) + mid
    bucket_pos = np.where(abs_pos <= mid, rel, log_pos * sign).astype(np.int64)
    return jnp.asarray(bucket_size - 1 + bucket_pos, dtype=jnp.int32)


# ----------------------------------------------------------------------------
# Full forward pass
# ----------------------------------------------------------------------------

def relative_mha_forward(params, queries, keys, values,
                         query_relative_embeddings, key_relative_embeddings,
                         num_heads, q_pos_idx, k_pos_idx):
    B, Qlen, H = queries.shape
    Klen = keys.shape[1]
    d = H // num_heads
    scale = 1.0 / math.sqrt(d)

    # Fold 1/sqrt(d) into the query projection weights at trace time.  The
    # scaled q then carries the scale for the content and c2p terms, and the
    # scaled rq_proj carries it for the p2c term — exactly matching the PyTorch
    # module, which multiplies all three score terms by self.scale.
    wq_s = params["Wq"] * scale
    bq_s = params["bq"] * scale

    # Q/K/V projections (tiled Pallas matmuls, bf16 outputs).
    q = linear(queries.reshape(B * Qlen, H), wq_s, bq_s).reshape(B, Qlen, H)
    k = linear(keys.reshape(B * Klen, H), params["Wk"], params["bk"]).reshape(B, Klen, H)
    v = linear(values.reshape(B * Klen, H), params["Wv"], params["bv"]).reshape(B, Klen, H)

    # Relative-embedding projections are tiny (7 / 31 rows): plain XLA matmuls.
    rq_proj = query_relative_embeddings @ wq_s.T + bq_s               # scale folded
    rk_proj = key_relative_embeddings @ params["Wk"].T + params["bk"]
    n_rq, n_rk = rq_proj.shape[0], rk_proj.shape[0]

    qh = q.reshape(B, Qlen, num_heads, d)                             # bf16
    kh = k.reshape(B, Klen, num_heads, d)                             # bf16
    rqph = rq_proj.reshape(n_rq, num_heads, d).astype(jnp.bfloat16)
    rkph = rk_proj.reshape(n_rk, num_heads, d).astype(jnp.bfloat16)

    # DeBERTa c2p / p2c: MXU matmuls against the *bucket* axis, then a static
    # index gather — no [Q, K, h, d] relative tensor anywhere.  The resulting
    # additive bias is handed to the attention kernel as bf16.
    # TODO(synk): move this gather inside the attention kernel (scalar-prefetched
    # index tables) to avoid materializing [B,h,Q,K] in HBM altogether.
    c2p = jnp.einsum('bqhd,rhd->bhqr', qh, rkph,
                     preferred_element_type=jnp.float32)              # [B,h,Q,n_rk]
    bias_c2p = jnp.take_along_axis(
        c2p, k_pos_idx[None, None, :Qlen, :Klen].astype(jnp.int32), axis=-1)
    p2c = jnp.einsum('rhd,bkhd->bhrk', rqph, kh,
                     preferred_element_type=jnp.float32)              # [B,h,n_rq,K]
    bias_p2c = jnp.take_along_axis(
        p2c, q_pos_idx[None, None, :Qlen, :Klen].astype(jnp.int32), axis=-2)
    bias = (bias_c2p + bias_p2c).astype(jnp.bfloat16)                 # [B,h,Q,K]

    # Fused attention on a (batch, head) parallel grid.
    attn = attention(q, k, v, bias, num_heads)                        # [B,Q,H] bf16

    # Output projection (f32 result, as in the PyTorch module).
    out = linear(attn.reshape(B * Qlen, H), params["Wo"], params["bo"],
                 out_dtype=jnp.float32)
    return out.reshape(B, Qlen, H)


# ----------------------------------------------------------------------------
# Pure-JAX reference (faithful transcription of the PyTorch forward, f32)
# ----------------------------------------------------------------------------

def reference_forward(params, queries, keys, values,
                      query_relative_embeddings, key_relative_embeddings,
                      num_heads, q_pos_idx, k_pos_idx):
    B, Qlen, H = queries.shape
    Klen = keys.shape[1]
    d = H // num_heads
    scale = 1.0 / math.sqrt(d)
    q = queries @ params["Wq"].T + params["bq"]
    k = keys @ params["Wk"].T + params["bk"]
    v = values @ params["Wv"].T + params["bv"]
    rq = query_relative_embeddings @ params["Wq"].T + params["bq"]
    rk = key_relative_embeddings @ params["Wk"].T + params["bk"]
    rel_q = rq[q_pos_idx[:Qlen, :Klen]].reshape(Qlen, Klen, num_heads, d)
    rel_k = rk[k_pos_idx[:Qlen, :Klen]].reshape(Qlen, Klen, num_heads, d)
    qh = q.reshape(B, Qlen, num_heads, d)
    kh = k.reshape(B, Klen, num_heads, d)
    vh = v.reshape(B, Klen, num_heads, d)
    s = jnp.einsum('bqhd,bkhd->bhqk', qh, kh) * scale
    s = s + jnp.einsum('bqhd,qkhd->bhqk', qh, rel_k * scale)
    s = s + jnp.einsum('bkhd,qkhd->bhqk', kh * scale, rel_q)
    p = jax.nn.softmax(s, axis=-1)
    o = jnp.einsum('bhqk,bkhd->bqhd', p, vh).reshape(B, Qlen, H)
    return o @ params["Wo"].T + params["bo"]


# ----------------------------------------------------------------------------
# Main
# ----------------------------------------------------------------------------

if __name__ == "__main__":
    hidden_size = 32
    num_heads = 4
    batch = 2
    seq = 8
    query_bucket = 4
    key_bucket = 16
    max_sequence_length = 1024

    root = jax.random.PRNGKey(0)
    ks = jax.random.split(root, 11)

    std = math.sqrt(2.0 / (5.0 * hidden_size))

    def trunc(kk, shape):
        return std * jax.random.truncated_normal(kk, -2.0, 2.0, shape, jnp.float32)

    bias_bound = 1.0 / math.sqrt(hidden_size)
    params = {
        "Wq": trunc(ks[0], (hidden_size, hidden_size)),
        "bq": jnp.zeros((hidden_size,), jnp.float32),             # zeroed in initialize()
        "Wk": trunc(ks[1], (hidden_size, hidden_size)),
        "bk": jax.random.uniform(ks[2], (hidden_size,), jnp.float32, -bias_bound, bias_bound),
        "Wv": trunc(ks[3], (hidden_size, hidden_size)),
        "bv": jax.random.uniform(ks[4], (hidden_size,), jnp.float32, -bias_bound, bias_bound),
        "Wo": trunc(ks[5], (hidden_size, hidden_size)),
        "bo": jnp.zeros((hidden_size,), jnp.float32),             # zeroed in initialize()
    }

    queries = jax.random.normal(ks[6], (batch, seq, hidden_size), jnp.float32)
    keys_in = jax.random.normal(ks[7], (batch, seq, hidden_size), jnp.float32)
    values_in = jax.random.normal(ks[8], (batch, seq, hidden_size), jnp.float32)
    query_rel_emb = jax.random.normal(ks[9], (2 * query_bucket - 1, hidden_size), jnp.float32)
    key_rel_emb = jax.random.normal(ks[10], (2 * key_bucket - 1, hidden_size), jnp.float32)

    q_pos_idx = build_position_indices(seq, seq, query_bucket, max_sequence_length)
    k_pos_idx = build_position_indices(seq, seq, key_bucket, max_sequence_length)

    fwd = jax.jit(relative_mha_forward, static_argnames=("num_heads",))
    out = fwd(params, queries, keys_in, values_in, query_rel_emb, key_rel_emb,
              num_heads=num_heads, q_pos_idx=q_pos_idx, k_pos_idx=k_pos_idx)
    jax.block_until_ready(out)
    assert out.shape == (batch, seq, hidden_size)

    # Loose-tolerance check against an f32 pure-JAX transcription of the module
    # (kernel path uses bf16 operands with f32 MXU accumulation).
    ref = reference_forward(params, queries, keys_in, values_in,
                            query_rel_emb, key_rel_emb,
                            num_heads, q_pos_idx, k_pos_idx)
    max_err = float(jnp.max(jnp.abs(out - ref)))
    assert jnp.allclose(out, ref, rtol=1e-1, atol=5e-2), f"max|diff|={max_err}"

    print("KERNEL_OK")
</pallas_src>

<mosaic_0001>
module attributes {stable_mosaic.version = 11 : i64} {
  func.func @_linear_kernel(%arg0: i32, %arg1: i32, %arg2: memref<16x32xbf16, #tpu.memory_space<vmem>>, %arg3: memref<32x32xbf16, #tpu.memory_space<vmem>>, %arg4: memref<1x32xf32, #tpu.memory_space<vmem>>, %arg5: memref<16x32xbf16, #tpu.memory_space<vmem>>) attributes {dimension_semantics = [#tpu.dimension_semantics<parallel>, #tpu.dimension_semantics<parallel>], iteration_bounds = array<i64: 1, 1>, scalar_prefetch = 0 : i64, scratch_operands = 0 : i64, tpu.core_type = #tpu.core_type<tc>, window_params = [{transform_indices = @transform_0, window_bounds = array<i64: 16, 32>}, {transform_indices = @transform_1, window_bounds = array<i64: 32, 32>}, {transform_indices = @transform_2, window_bounds = array<i64: 1, 32>}, {transform_indices = @transform_3, window_bounds = array<i64: 16, 32>}]} {
    %c0 = arith.constant 0 : index
    %c0_0 = arith.constant 0 : index
    %0 = vector.load %arg2[%c0, %c0_0] : memref<16x32xbf16, #tpu.memory_space<vmem>>, vector<16x32xbf16>
    %c0_1 = arith.constant 0 : index
    %c0_2 = arith.constant 0 : index
    %1 = vector.load %arg3[%c0_1, %c0_2] : memref<32x32xbf16, #tpu.memory_space<vmem>>, vector<32x32xbf16>
    %cst = arith.constant dense<0.000000e+00> : vector<16x32xf32>
    %2 = tpu.matmul %0, %1, %cst {dimension_numbers = #tpu.dot_dimension_numbers<[1], [0], [0], [1], [0, 0, 1, 1], [], []>} : vector<16x32xbf16>, vector<32x32xbf16>, vector<16x32xf32> -> vector<16x32xf32>
    %c0_3 = arith.constant 0 : index
    %c0_4 = arith.constant 0 : index
    %3 = vector.load %arg4[%c0_3, %c0_4] : memref<1x32xf32, #tpu.memory_space<vmem>>, vector<1x32xf32>
    %4 = vector.broadcast %3 : vector<1x32xf32> to vector<16x32xf32>
    %5 = arith.addf %2, %4 : vector<16x32xf32>
    %6 = arith.truncf %5 : vector<16x32xf32> to vector<16x32xbf16>
    %c0_5 = arith.constant 0 : index
    %c0_6 = arith.constant 0 : index
    %7 = vector.load %arg5[%c0_5, %c0_6] : memref<16x32xbf16, #tpu.memory_space<vmem>>, vector<16x32xbf16>
    tpu.vector_store %arg5[%c0_5, %c0_6], %6 {strides = array<i32>} : memref<16x32xbf16, #tpu.memory_space<vmem>>, vector<16x32xbf16>,
    return
  }
  func.func @transform_0(%arg0: i32, %arg1: i32) -> (i32, i32) {
    %c0_i32 = arith.constant 0 : i32
    %c0_i32_0 = arith.constant 0 : i32
    return %arg0, %c0_i32 : i32, i32
  }
  func.func @transform_1(%arg0: i32, %arg1: i32) -> (i32, i32) {
    %c0_i32 = arith.constant 0 : i32
    %c0_i32_0 = arith.constant 0 : i32
    return %c0_i32, %arg1 : i32, i32
  }
  func.func @transform_2(%arg0: i32, %arg1: i32) -> (i32, i32) {
    %c0_i32 = arith.constant 0 : i32
    %c0_i32_0 = arith.constant 0 : i32
    return %c0_i32, %arg1 : i32, i32
  }
  func.func @transform_3(%arg0: i32, %arg1: i32) -> (i32, i32) {
    %c0_i32 = arith.constant 0 : i32
    return %arg0, %arg1 : i32, i32
  }
}

module attributes {stable_mosaic.version = 11 : i64} {
  func.func @_attention_kernel(%arg0: i32, %arg1: i32, %arg2: memref<1x1x8x8xbf16, #tpu.memory_space<vmem>>, %arg3: memref<1x1x8x8xbf16, #tpu.memory_space<vmem>>, %arg4: memref<1x1x8x8xbf16, #tpu.memory_space<vmem>>, %arg5: memref<1x1x8x8xbf16, #tpu.memory_space<vmem>>, %arg6: memref<1x1x8x8xbf16, #tpu.memory_space<vmem>>) attributes {dimension_semantics = [#tpu.dimension_semantics<parallel>, #tpu.dimension_semantics<parallel>], iteration_bounds = array<i64: 2, 4>, scalar_prefetch = 0 : i64, scratch_operands = 0 : i64, tpu.core_type = #tpu.core_type<tc>, window_params = [{transform_indices = @transform_0, window_bounds = array<i64: 1, 1, 8, 8>}, {transform_indices = @transform_1, window_bounds = array<i64: 1, 1, 8, 8>}, {transform_indices = @transform_2, window_bounds = array<i64: 1, 1, 8, 8>}, {transform_indices = @transform_3, window_bounds = array<i64: 1, 1, 8, 8>}, {transform_indices = @transform_4, window_bounds = array<i64: 1, 1, 8, 8>}]} {
    %c0 = arith.constant 0 : index
    %c0_0 = arith.constant 0 : index
    %c0_1 = arith.constant 0 : index
    %c0_2 = arith.constant 0 : index
    %0 = vector.load %arg2[%c0, %c0_0, %c0_1, %c0_2] : memref<1x1x8x8xbf16, #tpu.memory_space<vmem>>, vector<1x1x8x8xbf16>
    %1 = vector.shape_cast %0 : vector<1x1x8x8xbf16> to vector<8x8xbf16>
    %c0_3 = arith.constant 0 : index
    %c0_4 = arith.constant 0 : index
    %c0_5 = arith.constant 0 : index
    %c0_6 = arith.constant 0 : index
    %2 = vector.load %arg3[%c0_3, %c0_4, %c0_5, %c0_6] : memref<1x1x8x8xbf16, #tpu.memory_space<vmem>>, vector<1x1x8x8xbf16>
    %3 = vector.shape_cast %2 : vector<1x1x8x8xbf16> to vector<8x8xbf16>
    %c0_7 = arith.constant 0 : index
    %c0_8 = arith.constant 0 : index
    %c0_9 = arith.constant 0 : index
    %c0_10 = arith.constant 0 : index
    %4 = vector.load %arg4[%c0_7, %c0_8, %c0_9, %c0_10] : memref<1x1x8x8xbf16, #tpu.memory_space<vmem>>, vector<1x1x8x8xbf16>
    %5 = vector.shape_cast %4 : vector<1x1x8x8xbf16> to vector<8x8xbf16>
    %cst = arith.constant dense<0.000000e+00> : vector<8x8xf32>
    %6 = tpu.matmul %1, %3, %cst {dimension_numbers = #tpu.dot_dimension_numbers<[1], [1], [0], [0], [0, 0, 1, 0], [], []>} : vector<8x8xbf16>, vector<8x8xbf16>, vector<8x8xf32> -> vector<8x8xf32>
    %c0_11 = arith.constant 0 : index
    %c0_12 = arith.constant 0 : index
    %c0_13 = arith.constant 0 : index
    %c0_14 = arith.constant 0 : index
    %7 = vector.load %arg5[%c0_11, %c0_12, %c0_13, %c0_14] : memref<1x1x8x8xbf16, #tpu.memory_space<vmem>>, vector<1x1x8x8xbf16>
    %8 = vector.shape_cast %7 : vector<1x1x8x8xbf16> to vector<8x8xbf16>
    %9 = arith.extf %8 : vector<8x8xbf16> to vector<8x8xf32>
    %10 = arith.addf %6, %9 : vector<8x8xf32>
    %cst_15 = arith.constant dense<0xFF800000> : vector<8xf32>
    %11 = vector.multi_reduction <maximumf>, %10, %cst_15 [1] : vector<8x8xf32> to vector<8xf32>
    %12 = vector.shape_cast %11 : vector<8xf32> to vector<8x1xf32>
    %13 = vector.broadcast %12 : vector<8x1xf32> to vector<8x8xf32>
    %14 = arith.subf %10, %13 : vector<8x8xf32>
    %15 = math.exp %14 : vector<8x8xf32>
    %cst_16 = arith.constant dense<0.000000e+00> : vector<8xf32>
    %16 = vector.multi_reduction <add>, %15, %cst_16 [1] : vector<8x8xf32> to vector<8xf32>
    %17 = vector.shape_cast %16 : vector<8xf32> to vector<8x1xf32>
    %18 = tpu.reciprocal %17 : vector<8x1xf32> -> vector<8x1xf32>
    %19 = vector.broadcast %18 : vector<8x1xf32> to vector<8x8xf32>
    %20 = arith.mulf %15, %19 : vector<8x8xf32>
    %21 = arith.truncf %20 : vector<8x8xf32> to vector<8x8xbf16>
    %cst_17 = arith.constant dense<0.000000e+00> : vector<8x8xf32>
    %22 = tpu.matmul %21, %5, %cst_17 {dimension_numbers = #tpu.dot_dimension_numbers<[1], [0], [0], [1], [0, 0, 1, 1], [], []>} : vector<8x8xbf16>, vector<8x8xbf16>, vector<8x8xf32> -> vector<8x8xf32>
    %23 = arith.truncf %22 : vector<8x8xf32> to vector<8x8xbf16>
    %c0_18 = arith.constant 0 : index
    %c0_19 = arith.constant 0 : index
    %c0_20 = arith.constant 0 : index
    %c0_21 = arith.constant 0 : index
    %24 = vector.load %arg6[%c0_18, %c0_19, %c0_20, %c0_21] : memref<1x1x8x8xbf16, #tpu.memory_space<vmem>>, vector<1x1x8x8xbf16>
    %25 = vector.shape_cast %24 : vector<1x1x8x8xbf16> to vector<8x8xbf16>
    %26 = vector.shape_cast %23 : vector<8x8xbf16> to vector<1x1x8x8xbf16>
    tpu.vector_store %arg6[%c0_18, %c0_19, %c0_20, %c0_21], %26 {strides = array<i32>} : memref<1x1x8x8xbf16, #tpu.memory_space<vmem>>, vector<1x1x8x8xbf16>,
    return
  }
  func.func @transform_0(%arg0: i32, %arg1: i32) -> (i32, i32, i32, i32) {
    %c0_i32 = arith.constant 0 : i32
    %c0_i32_0 = arith.constant 0 : i32
    %c0_i32_1 = arith.constant 0 : i32
    return %arg0, %arg1, %c0_i32, %c0_i32_0 : i32, i32, i32, i32
  }
  func.func @transform_1(%arg0: i32, %arg1: i32) -> (i32, i32, i32, i32) {
    %c0_i32 = arith.constant 0 : i32
    %c0_i32_0 = arith.constant 0 : i32
    %c0_i32_1 = arith.constant 0 : i32
    return %arg0, %arg1, %c0_i32, %c0_i32_0 : i32, i32, i32, i32
  }
  func.func @transform_2(%arg0: i32, %arg1: i32) -> (i32, i32, i32, i32) {
    %c0_i32 = arith.constant 0 : i32
    %c0_i32_0 = arith.constant 0 : i32
    %c0_i32_1 = arith.constant 0 : i32
    return %arg0, %arg1, %c0_i32, %c0_i32_0 : i32, i32, i32, i32
  }
  func.func @transform_3(%arg0: i32, %arg1: i32) -> (i32, i32, i32, i32) {
    %c0_i32 = arith.constant 0 : i32
    %c0_i32_0 = arith.constant 0 : i32
    %c0_i32_1 = arith.constant 0 : i32
    return %arg0, %arg1, %c0_i32, %c0_i32_0 : i32, i32, i32, i32
  }
  func.func @transform_4(%arg0: i32, %arg1: i32) -> (i32, i32, i32, i32) {
    %c0_i32 = arith.constant 0 : i32
    %c0_i32_0 = arith.constant 0 : i32
    %c0_i32_1 = arith.constant 0 : i32
    return %arg0, %arg1, %c0_i32, %c0_i32_0 : i32, i32, i32, i32
  }
}

module attributes {stable_mosaic.version = 11 : i64} {
  func.func @_linear_kernel(%arg0: i32, %arg1: i32, %arg2: memref<16x32xbf16, #tpu.memory_space<vmem>>, %arg3: memref<32x32xbf16, #tpu.memory_space<vmem>>, %arg4: memref<1x32xf32, #tpu.memory_space<vmem>>, %arg5: memref<16x32xf32, #tpu.memory_space<vmem>>) attributes {dimension_semantics = [#tpu.dimension_semantics<parallel>, #tpu.dimension_semantics<parallel>], iteration_bounds = array<i64: 1, 1>, scalar_prefetch = 0 : i64, scratch_operands = 0 : i64, tpu.core_type = #tpu.core_type<tc>, window_params = [{transform_indices = @transform_0, window_bounds = array<i64: 16, 32>}, {transform_indices = @transform_1, window_bounds = array<i64: 32, 32>}, {transform_indices = @transform_2, window_bounds = array<i64: 1, 32>}, {transform_indices = @transform_3, window_bounds = array<i64: 16, 32>}]} {
    %c0 = arith.constant 0 : index
    %c0_0 = arith.constant 0 : index
    %0 = vector.load %arg2[%c0, %c0_0] : memref<16x32xbf16, #tpu.memory_space<vmem>>, vector<16x32xbf16>
    %c0_1 = arith.constant 0 : index
    %c0_2 = arith.constant 0 : index
    %1 = vector.load %arg3[%c0_1, %c0_2] : memref<32x32xbf16, #tpu.memory_space<vmem>>, vector<32x32xbf16>
    %cst = arith.constant dense<0.000000e+00> : vector<16x32xf32>
    %2 = tpu.matmul %0, %1, %cst {dimension_numbers = #tpu.dot_dimension_numbers<[1], [0], [0], [1], [0, 0, 1, 1], [], []>} : vector<16x32xbf16>, vector<32x32xbf16>, vector<16x32xf32> -> vector<16x32xf32>
    %c0_3 = arith.constant 0 : index
    %c0_4 = arith.constant 0 : index
    %3 = vector.load %arg4[%c0_3, %c0_4] : memref<1x32xf32, #tpu.memory_space<vmem>>, vector<1x32xf32>
    %4 = vector.broadcast %3 : vector<1x32xf32> to vector<16x32xf32>
    %5 = arith.addf %2, %4 : vector<16x32xf32>
    %c0_5 = arith.constant 0 : index
    %c0_6 = arith.constant 0 : index
    %6 = vector.load %arg5[%c0_5, %c0_6] : memref<16x32xf32, #tpu.memory_space<vmem>>, vector<16x32xf32>
    tpu.vector_store %arg5[%c0_5, %c0_6], %5 {strides = array<i32>} : memref<16x32xf32, #tpu.memory_space<vmem>>, vector<16x32xf32>,
    return
  }
  func.func @transform_0(%arg0: i32, %arg1: i32) -> (i32, i32) {
    %c0_i32 = arith.constant 0 : i32
    %c0_i32_0 = arith.constant 0 : i32
    return %arg0, %c0_i32 : i32, i32
  }
  func.func @transform_1(%arg0: i32, %arg1: i32) -> (i32, i32) {
    %c0_i32 = arith.constant 0 : i32
    %c0_i32_0 = arith.constant 0 : i32
    return %c0_i32, %arg1 : i32, i32
  }
  func.func @transform_2(%arg0: i32, %arg1: i32) -> (i32, i32) {
    %c0_i32 = arith.constant 0 : i32
    %c0_i32_0 = arith.constant 0 : i32
    return %c0_i32, %arg1 : i32, i32
  }
  func.func @transform_3(%arg0: i32, %arg1: i32) -> (i32, i32) {
    %c0_i32 = arith.constant 0 : i32
    return %arg0, %arg1 : i32, i32
  }
}

</mosaic_0001>

<bundles_post_ra>
// kernel: relative_mha_forward.5
= control target key start
LH: loop header
LB: loop body
LE: loop exit
PB: predicated region body
PF: predicated region fallthrough
CT: control target
= control target key end

     0   :  { %vm42_vm0 = vcmask 261120   ;;  %vm62_vm1 = vcmask 257024   ;;  %s124_s1 = inlined_call_operand.vmem [shape: bf16[32,32], index: 1, kind: input, shape index: {}]   ;;  %s125_s2 = inlined_call_operand.vmem [shape: f32[1,32], index: 2, kind: input, shape index: {}]   ;;  %s126_s0 = inlined_call_operand.vmem [shape: bf16[16,32], index: 0, kind: input, shape index: {}]   ;;  %s127_s3 = inlined_call_operand.vmem [shape: bf16[16,32], index: 3, kind: output, shape index: {}]  }
   0x1   :  { %v84_v0 = vld [vmem:[%s124_s1 + $0x8] sm:$0xff]  ;;  %v83_v1 = vld [vmem:[%s124_s1] sm:$0xff] }
   0x2   :  { %52 = vmatpush.bf16.msra.mxu0 %v84_v0  ;;  %v82_v2 = vld [vmem:[%s126_s0] sm:$0xff] }
   0x3   :  { %v85_v3 = vld [vmem:[%s125_s2] ss:$0 sm:$0xff] }
   0x6   :  { %53 = vmatpush.bf16.msra.mxu0 %v83_v1 }
   0x9   :  { %81 = vmatmul.msk.bf16.vlgmr.msra.gmra.mxu0 %vm42_vm0, %v82_v2 }
  0x86   :  { %v55_v4 = vpop.f32.mrf.mxu0 }
  0x87   :  { %v56_v5 = vadd.f32 %v85_v3, %v55_v4 }
  0x89   :  { %v60_v6 = vpack.c.bf16 %v56_v5, %v56_v5 }
  0x8b   :  { %63 = vst.msk [vmem:[%s127_s3] sm:$0xf] %vm62_vm1, %v60_v6 }
  0x8e   :  { %v57_v7 = vpop.f32.mrf.mxu0 }
  0x8f   :  { %v58_v8 = vadd.f32 %v85_v3, %v57_v7 }
  0x91   :  { %v61_v9 = vpack.c.bf16 %v58_v8, %v58_v8 }
  0x93   :  { %64 = vst.msk [vmem:[%s127_s3 + $0x4] sm:$0xf] %vm62_vm1, %v61_v9 }

// kernel: relative_mha_forward.8
= control target key start
LH: loop header
LB: loop body
LE: loop exit
PB: predicated region body
PF: predicated region fallthrough
CT: control target
= control target key end

     0   :  { %s664_s15 = smov 0   ;;  %s666_s16 = smov 0   ;;  %s736_s0 = inlined_call_operand.vmem [shape: bf16[2,4,8,8], index: 0, kind: input, shape index: {}]   ;;  %s737_s1 = inlined_call_operand.vmem [shape: bf16[2,4,8,8], index: 1, kind: input, shape index: {}]   ;;  %s738_s2 = inlined_call_operand.vmem [shape: bf16[2,4,8,8], index: 2, kind: input, shape index: {}]   ;;  %s739_s3 = inlined_call_operand.vmem [shape: bf16[2,4,8,8], index: 3, kind: input, shape index: {}]   ;;  %s740_s4 = inlined_call_operand.vmem [shape: bf16[2,4,8,8], index: 4, kind: output, shape index: {}]  }
   0x1   :  { %s668_s17 = smov 0   ;;  %s670_s18 = smov 0  }
   0x2   :  { %s672_s19 = smov 0  }
   0x3 LB: > { %s23_s20 = sadd.s32 1, %s629_s17  ;;  %s26_s21 = sadd.s32 1, %s633_s18  ;;  %s637_s19 = sphi %s672_s19, %s14_s19   ;;  %s633_s18 = sphi %s670_s18, %s744_s18   ;;  %s629_s17 = sphi %s668_s17, %s743_s17   ;;  %s625_s16 = sphi %s666_s16, %s742_s16   ;;  %s621_s15 = sphi %s664_s15, %s741_s15  }
   0x4   : > { %p24_p0 = scmp.ge.s32.totalorder %s23_s20, 4  ;;  %p540_p1 = scmp.ge.s32.totalorder %s637_s19, 1 }
   0x5   : > { %p226_p2 = scmp.lt.s32.totalorder %s637_s19, 9 }
   0x6   : > { %s746_s20 = smov (%p24_p0, %s23_s20), 0  ;;  %s748_s21 = smov (!%p24_p0, %s26_s21), %s633_s18 }
   0x7   : > { %p227_p3 = pnand %p540_p1, %p226_p2  ;;  %p28_p4 = scmp.ge.s32.totalorder %s748_s21, 2 }
   0x8   : > { %p282_p5 = scmp.lt.s32.totalorder (!%p227_p3), %s625_s16, 1  ;;  %p284_p6 = scmp.lt.s32.totalorder (!%p227_p3), %s621_s15, 3 }
   0x9   : > { %s750_s21 = smov (%p28_p4, %s748_s21), 0  ;;  %230 = sbr.rel (%p227_p3) target bundleno = 556 (0x22c), region = 36 }
   0xe   : > { %s752_s16 = smov (!%p282_p5, %s625_s16), 1  ;;  %s754_s15 = smov (!%p284_p6, %s621_s15), 3  ;;  %vm328_vm0 = vcmask 64512   ;;  %vm376_vm1 = vcmask 1043456   ;;  %vm394_vm6 = vcmask 60416  }
   0xf   : > { %s541_s22 = sshll.u32 %s752_s16, 2 }
  0x10   : > { %s287_s23 = sadd.s32 %s541_s22, %s754_s15 }
  0x11   : > { %s694_s24 = sshll.u32 %s287_s23, 2 }
  0x12   : > { %s297_s27 = scalar_lea.vmem %s737_s1, %s694_s24  ;;  %s289_s30 = scalar_lea.vmem %s736_s0, %s694_s24 }
  0x13   : > { %v324_v0 = vld [vmem:[%s297_s27] sm:$0xf]  ;;  %s313_s7 = scalar_lea.vmem %s739_s3, %s694_s24  ;;  %s305_s10 = scalar_lea.vmem %s738_s2, %s694_s24 }
  0x14   : > { %v333_v1 = vsel %vm328_vm0, %v324_v0, 0  ;;  %v323_v2 = vld [vmem:[%s289_s30] sm:$0xf]  ;;  %s321_s13 = scalar_lea.vmem %s740_s4, %s694_s24 }
  0x15   : > { %342 = vmatpush.bf16.xpose.msra.mxu0 %v333_v1  ;;  %v326_v3 = vld [vmem:[%s313_s7] sm:$0xf] }
  0x16   : > { %v327_v4 = vunpack.c.l.bf16 %v326_v3  ;;  %v325_v14 = vld [vmem:[%s305_s10] sm:$0xf] }
  0x17   : > { %v378_v15 = vsel %vm376_vm1, %v325_v14, 0 }
  0x18   : > { %387 = vmatpush.bf16.msra.mxu1 %v378_v15 }
  0x1c   : > { %551 = vmatmul.msk.bf16.vlgmr.msra.gmra.mxu0 %vm328_vm0, %v323_v2 }
  0x99   : > { %v344_v5 = vpop.f32.mrf.mxu0 }
  0x9a   : > { %v345_v6 = vadd.f32 %v344_v5, %v327_v4 }
  0x9c   : > { %v348_v7 = vsel %vm328_vm0, %v345_v6, -inf }
  0x9d   : > { %349 = vmax.xlane.f32.xlu0 %v348_v7 }
  0xa1   : > { %v346_v8 = vpop.f32.mrf.mxu0 }
 0x110   : > { %v350_v9 = vpop.xlane.xlu0 %349 }
 0x111   : > { %v351_v10 = vsub.f32 %v345_v6, %v350_v9 }
 0x113   : > { %v352_v11 = vmul.f32 1.442695, %v351_v10 }
 0x115   : > { %595 = vpow2.f32 %v352_v11 }
 0x11b   : > { %v596_v12 = vpop.eup %595 }
 0x11c   : > { %v354_v13 = vsel %vm328_vm0, %v596_v12, 0.0 }
 0x11d   : > { %355 = vadd.xlane.f32.xlu0 %v354_v13 }
 0x190   : > { %v356_v16 = vpop.xlane.xlu0 %355 }
 0x191   : > { %597 = vrcp.f32 %v356_v16  ;;  %v368_v20 = vand.u32 2147483648, %v356_v16  ;;  %v366_v22 = vand.u32 2147483647, %v356_v16  ;;  %vm362_vm3 = vweird.f32 %v356_v16 }
 0x193   : > { %v369_v24 = vor.u32 1.1754944e-38, %v368_v20  ;;  %vm367_vm5 = vcmp.eq.f32.partialorder %v366_v22, 8.507059e+37 }
 0x197   : > { %v598_v17 = vpop.eup %597 }
 0x198   : > { %v358_v18 = vmul.f32 %v598_v17, %v356_v16  ;;  %vm363_vm2 = vweird.f32 %v598_v17 }
 0x199   : > { %vm364_vm4 = vmor %vm362_vm3, %vm363_vm2 }
 0x19a   : > { %v359_v19 = vsub.f32 1.0, %v358_v18 }
 0x19c   : > { %v360_v21 = vmul.f32 %v598_v17, %v359_v19 }
 0x19e   : > { %v361_v23 = vadd.f32 %v598_v17, %v360_v21 }
 0x1a0   : > { %v365_v25 = vsel %vm364_vm4, %v598_v17, %v361_v23 }
 0x1a1   : > { %v370_v26 = vsel %vm367_vm5, %v369_v24, %v365_v25 }
 0x1a2   : > { %v371_v27 = vmul.f32 %v596_v12, %v370_v26 }
 0x1a4   : > { %v372_v28 = vpack.c.bf16 %v371_v27, %v371_v27 }
 0x1a6   : > { %552 = vmatmul.msk.bf16.vlgmr.msra.gmra.mxu1 %vm328_vm0, %v372_v28 }
 0x223   : > { %v389_v29 = vpop.f32.mrf.mxu1 }
 0x224   : > { %v393_v30 = vpack.c.bf16 %v389_v29, %v389_v29 }
 0x226   : > { %395 = vst.msk [vmem:[%s321_s13] sm:$0xf] %vm394_vm6, %v393_v30 }
 0x22b   : > { %v391_v31 = vpop.f32.mrf.mxu1 }
 0x22c PF: > { %s14_s19 = sadd.s32 1, %s637_s19   ;;  %s741_s15 = smov %s629_s17 }
 0x22d   : > { %p11_p7 = scmp.ge.s32.totalorder %s14_s19, 10   ;;  %s742_s16 = smov %s633_s18 }
 0x22e   : > { %s743_s17 = smov %s746_s20  ;;  %s744_s18 = smov %s750_s21 }
 0x22f   :  { %13 = sbr.rel (!%p11_p7) target bundleno = 3 (0x3), region = 75 }

// kernel: relative_mha_forward.9
= control target key start
LH: loop header
LB: loop body
LE: loop exit
PB: predicated region body
PF: predicated region fallthrough
CT: control target
= control target key end

     0   :  { %s165_s0 = inlined_call_operand.vmem [shape: bf16[16,32], index: 0, kind: input, shape index: {}]   ;;  %s166_s1 = inlined_call_operand.vmem [shape: bf16[32,32], index: 1, kind: input, shape index: {}]   ;;  %s167_s2 = inlined_call_operand.vmem [shape: f32[1,32], index: 2, kind: input, shape index: {}]   ;;  %s168_s3 = inlined_call_operand.hbm [shape: f32[16,32], index: 3, kind: output, shape index: {}]  }
   0x1   :  { %v96_v0 = vld [vmem:[%s166_s1 + $0x8] sm:$0xff] }
   0x2   :  { %8 = vsyncpa [#allocation3], 0  ;;  %53 = vmatpush.bf16.msra.mxu0 %v96_v0  ;;  %v95_v1 = vld [vmem:[%s166_s1] sm:$0xff]  ;;  %vm43_vm0 = vcmask 261120   ;;  %s127_s20 = smov [#allocation2]   ;;  %s69_s1 = sshll.u32 %s168_s3, 4  ;;  %s70_s1 = int_to_ptr.hbm [resolvable:$true] %s69_s1 }
   0x3   :  { %v94_v2 = vld [vmem:[%s165_s0] sm:$0xff]  ;;  %s67_s21 = sshll.u32 %s127_s20, 4  ;;  %s128_s0 = smov 128   ;;  %s68_s21 = int_to_ptr.vmem [resolvable:$true] %s67_s21 }
   0x4   :  { %v100_v3 = vld [vmem:[%s167_s2] ss:$0 sm:$0xff]  ;;  %s129_s24 = smov 8  }
   0x6   :  { %54 = vmatpush.bf16.msra.mxu0 %v95_v1 }
   0x9   :  { %93 = vmatmul.msk.bf16.vlgmr.msra.gmra.mxu0 %vm43_vm0, %v94_v2 }
  0x86   :  { %v56_v4 = vpop.f32.mrf.mxu0 }
  0x87   :  { %v57_v5 = vadd.f32 %v100_v3, %v56_v4 }
  0x89   :  { %61 = vst.msk [vmem:[#allocation2] sm:$0xff] %vm43_vm0, %v57_v5 }
  0x8e   :  { %v58_v6 = vpop.f32.mrf.mxu0 }
  0x8f   :  { %v59_v7 = vadd.f32 %v100_v3, %v58_v6 }
  0x91   :  { %62 = vst.msk [vmem:[#allocation2 + $0x8] sm:$0xff] %vm43_vm0, %v59_v7 }
  0x92   :  { %75 = dma.vmem_to_hbm [thread:$0]  %s68_s21, 256, %s70_s1, [#allocation3], %s128_s0, %s128_s0, %s129_s24  }
  0x93   :  { %125 = dma.done.wait [#allocation3], 256  }
  0x94   :  { %126 = vsyncadd [#allocation3], 4294967040 }
  0x95   :  { %80 = vsyncpa [#allocation3], 1 }

</bundles_post_ra>
